<compile_context>
chip_gen: v7x
topology: tpu7x:2x2x1
jax: 0.10.0
libtpu: 0.0.40
codegen_flags: <defaults>
</compile_context>

<pallas_src>
import math

import jax
import jax.numpy as jnp
from jax.experimental import pallas as pl
from jax.experimental.pallas import tpu as pltpu


def _round_up(x: int, m: int) -> int:
    return ((x + m - 1) // m) * m


# ---------------------------------------------------------------------------
# Kernels
# ---------------------------------------------------------------------------
def _linear_eval_kernel(x_ref, w_ref, b_ref, o_ref, acc_ref):
    """Eval path: o = x @ w + b (no noise operand exists at all)."""
    k = pl.program_id(2)

    @pl.when(k == 0)
    def _init():
        acc_ref[...] = jnp.zeros_like(acc_ref)

    acc_ref[...] += jnp.dot(x_ref[...], w_ref[...],
                            preferred_element_type=jnp.float32)

    @pl.when(k == pl.num_programs(2) - 1)
    def _finalize():
        # Bias add + lane-dense writeback exactly once per (i, j) tile.
        o_ref[...] = (acc_ref[...] + b_ref[...]).astype(o_ref.dtype)


def _noisy_linear_train_kernel(x_ref, n_ref, w_ref, b_ref, o_ref, acc_ref):
    """Training path: o = (x + noise) @ w + b, add fused in VMEM before MXU."""
    k = pl.program_id(2)

    @pl.when(k == 0)
    def _init():
        acc_ref[...] = jnp.zeros_like(acc_ref)

    x = x_ref[...] + n_ref[...]
    acc_ref[...] += jnp.dot(x, w_ref[...], preferred_element_type=jnp.float32)

    @pl.when(k == pl.num_programs(2) - 1)
    def _finalize():
        o_ref[...] = (acc_ref[...] + b_ref[...]).astype(o_ref.dtype)


# ---------------------------------------------------------------------------
# Wrapper
# ---------------------------------------------------------------------------
def noisy_linear(x, w, b, *, noise_stddev=0.1, training=False, key=None,
                 tile_m=256, tile_n=256, tile_k=512):
    """Pallas equivalent of NoisyLinear.forward(x, training)."""
    B, K = x.shape
    Kw, N = w.shape
    assert K == Kw, "x / w inner dimensions must match"

    # 8/128-aligned tiles; small dims collapse to a single full-extent tile.
    tm = min(tile_m, _round_up(B, 8))
    tn = min(tile_n, _round_up(N, 128))
    tk = min(tile_k, _round_up(K, 128))
    Mp, Np, Kp = _round_up(B, tm), _round_up(N, tn), _round_up(K, tk)

    # Zero-pad to the tiled shape (zero K-padding is exact for the matmul:
    # padded x / noise columns hit zero weight rows).
    x_p = x.astype(jnp.float32)
    if (Mp, Kp) != (B, K):
        x_p = jnp.pad(x_p, ((0, Mp - B), (0, Kp - K)))
    w_p = w.astype(jnp.float32)
    if (Kp, Np) != (K, N):
        w_p = jnp.pad(w_p, ((0, Kp - K), (0, Np - N)))
    b_p = b.reshape(1, N).astype(jnp.float32)
    if Np != N:
        b_p = jnp.pad(b_p, ((0, 0), (0, Np - N)))

    grid = (Mp // tm, Np // tn, Kp // tk)
    out_shape = jax.ShapeDtypeStruct((Mp, Np), jnp.float32)
    compiler_params = pltpu.CompilerParams(
        dimension_semantics=("parallel", "parallel", "arbitrary"),
        vmem_limit_bytes=32 * 1024 * 1024,
    )
    scratch = [pltpu.VMEM((tm, tn), jnp.float32)]

    if training:
        if key is None:
            key = jax.random.PRNGKey(0)
        # torch.normal(0.0, noise_stddev, x.shape) equivalent.
        noise = noise_stddev * jax.random.normal(key, (B, K), dtype=jnp.float32)
        n_p = noise
        if (Mp, Kp) != (B, K):
            n_p = jnp.pad(n_p, ((0, Mp - B), (0, Kp - K)))

        grid_spec = pltpu.PrefetchScalarGridSpec(
            num_scalar_prefetch=0,
            grid=grid,
            in_specs=[
                pl.BlockSpec((tm, tk), lambda i, j, k: (i, k)),  # x
                pl.BlockSpec((tm, tk), lambda i, j, k: (i, k)),  # noise
                pl.BlockSpec((tk, tn), lambda i, j, k: (k, j)),  # w
                pl.BlockSpec((1, tn), lambda i, j, k: (0, j)),   # b
            ],
            out_specs=pl.BlockSpec((tm, tn), lambda i, j, k: (i, j)),
            scratch_shapes=scratch,
        )
        out_p = pl.pallas_call(
            _noisy_linear_train_kernel, out_shape=out_shape,
            grid_spec=grid_spec, compiler_params=compiler_params,
        )(x_p, n_p, w_p, b_p)
    else:
        grid_spec = pltpu.PrefetchScalarGridSpec(
            num_scalar_prefetch=0,
            grid=grid,
            in_specs=[
                pl.BlockSpec((tm, tk), lambda i, j, k: (i, k)),  # x
                pl.BlockSpec((tk, tn), lambda i, j, k: (k, j)),  # w
                pl.BlockSpec((1, tn), lambda i, j, k: (0, j)),   # b
            ],
            out_specs=pl.BlockSpec((tm, tn), lambda i, j, k: (i, j)),
            scratch_shapes=scratch,
        )
        out_p = pl.pallas_call(
            _linear_eval_kernel, out_shape=out_shape,
            grid_spec=grid_spec, compiler_params=compiler_params,
        )(x_p, w_p, b_p)

    return out_p[:B, :N]


def init_noisy_linear_params(key, input_size, output_size):
    """nn.init.xavier_uniform_ equivalent + zero bias."""
    bound = math.sqrt(6.0 / (input_size + output_size))
    w = jax.random.uniform(key, (input_size, output_size), dtype=jnp.float32,
                           minval=-bound, maxval=bound)
    b = jnp.zeros((output_size,), dtype=jnp.float32)
    return w, b


if __name__ == "__main__":
    root = jax.random.PRNGKey(0)
    k_w, k_x, k_noise, k_noise2, k_w2, k_x2, k_noise3 = jax.random.split(root, 7)

    # --- 1) XOR-scale shapes from the original module: data (200, 2), layer 2->4.
    B, input_size, output_size = 200, 2, 4
    noise_stddev = 0.1

    w, b = init_noisy_linear_params(k_w, input_size, output_size)
    x = jax.random.uniform(k_x, (B, input_size), dtype=jnp.float32,
                           minval=-1.0, maxval=1.0)
    ref_eval = x @ w + b[None, :]

    # Eval path: exact x @ w + b.
    out_eval = jax.block_until_ready(
        noisy_linear(x, w, b, noise_stddev=noise_stddev, training=False))
    assert out_eval.shape == (B, output_size)
    assert jnp.allclose(out_eval, ref_eval, atol=1e-5, rtol=1e-5)

    # Training path: noise sampled from the same key as the kernel wrapper ->
    # exact reference comparison, plus determinism / seed-sensitivity checks.
    out_train = jax.block_until_ready(
        noisy_linear(x, w, b, noise_stddev=noise_stddev, training=True,
                     key=k_noise))
    noise_ref = noise_stddev * jax.random.normal(k_noise, (B, input_size),
                                                 dtype=jnp.float32)
    ref_train = (x + noise_ref) @ w + b[None, :]
    assert out_train.shape == (B, output_size)
    assert jnp.allclose(out_train, ref_train, atol=1e-5, rtol=1e-5)

    out_train_again = jax.block_until_ready(
        noisy_linear(x, w, b, noise_stddev=noise_stddev, training=True,
                     key=k_noise))
    out_train_other = jax.block_until_ready(
        noisy_linear(x, w, b, noise_stddev=noise_stddev, training=True,
                     key=k_noise2))
    assert jnp.array_equal(out_train, out_train_again)      # same key -> same noise
    assert not jnp.array_equal(out_train, out_train_other)  # new key  -> new noise

    # --- 2) A larger (still small) shape that exercises the full (i, j, k)
    #        grid, padding in every dim and the K-axis accumulator.
    B2, in2, out2 = 384, 1024, 320
    w2 = jax.random.normal(k_w2, (in2, out2), dtype=jnp.float32) * 0.02
    b2 = jnp.linspace(-1.0, 1.0, out2, dtype=jnp.float32)
    x2 = jax.random.normal(k_x2, (B2, in2), dtype=jnp.float32)

    out2_eval = jax.block_until_ready(noisy_linear(x2, w2, b2, training=False))
    ref2 = x2 @ w2 + b2[None, :]
    assert out2_eval.shape == (B2, out2)
    assert jnp.allclose(out2_eval, ref2, atol=2e-2, rtol=2e-2)

    out2_train = jax.block_until_ready(
        noisy_linear(x2, w2, b2, noise_stddev=noise_stddev, training=True,
                     key=k_noise3))
    noise2_ref = noise_stddev * jax.random.normal(k_noise3, (B2, in2),
                                                  dtype=jnp.float32)
    ref2_train = (x2 + noise2_ref) @ w2 + b2[None, :]
    assert jnp.allclose(out2_train, ref2_train, atol=2e-2, rtol=2e-2)

    print("KERNEL_OK")
</pallas_src>

<mosaic_0001>
module attributes {stable_mosaic.version = 11 : i64} {
  func.func @_linear_eval_kernel(%arg0: i32, %arg1: i32, %arg2: i32, %arg3: memref<200x128xf32, #tpu.memory_space<vmem>>, %arg4: memref<128x128xf32, #tpu.memory_space<vmem>>, %arg5: memref<1x128xf32, #tpu.memory_space<vmem>>, %arg6: memref<200x128xf32, #tpu.memory_space<vmem>>, %arg7: memref<200x128xf32, #tpu.memory_space<vmem>>) attributes {dimension_semantics = [#tpu.dimension_semantics<parallel>, #tpu.dimension_semantics<parallel>, #tpu.dimension_semantics<arbitrary>], iteration_bounds = array<i64: 1, 1, 1>, scalar_prefetch = 0 : i64, scratch_operands = 1 : i64, tpu.core_type = #tpu.core_type<tc>, window_params = [{transform_indices = @transform_0, window_bounds = array<i64: 200, 128>}, {transform_indices = @transform_1, window_bounds = array<i64: 128, 128>}, {transform_indices = @transform_2, window_bounds = array<i64: 1, 128>}, {transform_indices = @transform_3, window_bounds = array<i64: 200, 128>}]} {
    %c0_i32 = arith.constant 0 : i32
    %0 = arith.cmpi eq, %arg2, %c0_i32 : i32
    %1 = arith.extui %0 : i1 to i32
    %c0_i32_0 = arith.constant 0 : i32
    %2 = arith.cmpi ne, %1, %c0_i32_0 : i32
    scf.if %2 {
      %cst_10 = arith.constant 0.000000e+00 : f32
      %12 = vector.broadcast %cst_10 : f32 to vector<200x128xf32>
      %c0_11 = arith.constant 0 : index
      %c0_12 = arith.constant 0 : index
      %13 = vector.load %arg7[%c0_11, %c0_12] : memref<200x128xf32, #tpu.memory_space<vmem>>, vector<200x128xf32>
      tpu.vector_store %arg7[%c0_11, %c0_12], %12 {strides = array<i32>} : memref<200x128xf32, #tpu.memory_space<vmem>>, vector<200x128xf32>,
    } else {
    }
    %c0 = arith.constant 0 : index
    %c0_1 = arith.constant 0 : index
    %3 = vector.load %arg7[%c0, %c0_1] : memref<200x128xf32, #tpu.memory_space<vmem>>, vector<200x128xf32>
    %c0_2 = arith.constant 0 : index
    %c0_3 = arith.constant 0 : index
    %4 = vector.load %arg3[%c0_2, %c0_3] : memref<200x128xf32, #tpu.memory_space<vmem>>, vector<200x128xf32>
    %c0_4 = arith.constant 0 : index
    %c0_5 = arith.constant 0 : index
    %5 = vector.load %arg4[%c0_4, %c0_5] : memref<128x128xf32, #tpu.memory_space<vmem>>, vector<128x128xf32>
    %cst = arith.constant dense<0.000000e+00> : vector<200x128xf32>
    %6 = tpu.matmul %4, %5, %cst {dimension_numbers = #tpu.dot_dimension_numbers<[1], [0], [0], [1], [0, 0, 1, 1], [], []>} : vector<200x128xf32>, vector<128x128xf32>, vector<200x128xf32> -> vector<200x128xf32>
    %7 = arith.addf %3, %6 : vector<200x128xf32>
    %c0_6 = arith.constant 0 : index
    %c0_7 = arith.constant 0 : index
    %8 = vector.load %arg7[%c0_6, %c0_7] : memref<200x128xf32, #tpu.memory_space<vmem>>, vector<200x128xf32>
    tpu.vector_store %arg7[%c0_6, %c0_7], %7 {strides = array<i32>} : memref<200x128xf32, #tpu.memory_space<vmem>>, vector<200x128xf32>,
    %c0_i32_8 = arith.constant 0 : i32
    %9 = arith.cmpi eq, %arg2, %c0_i32_8 : i32
    %10 = arith.extui %9 : i1 to i32
    %c0_i32_9 = arith.constant 0 : i32
    %11 = arith.cmpi ne, %10, %c0_i32_9 : i32
    scf.if %11 {
      %c0_10 = arith.constant 0 : index
      %c0_11 = arith.constant 0 : index
      %12 = vector.load %arg7[%c0_10, %c0_11] : memref<200x128xf32, #tpu.memory_space<vmem>>, vector<200x128xf32>
      %c0_12 = arith.constant 0 : index
      %c0_13 = arith.constant 0 : index
      %13 = vector.load %arg5[%c0_12, %c0_13] : memref<1x128xf32, #tpu.memory_space<vmem>>, vector<1x128xf32>
      %14 = vector.broadcast %13 : vector<1x128xf32> to vector<200x128xf32>
      %15 = arith.addf %12, %14 : vector<200x128xf32>
      %c0_14 = arith.constant 0 : index
      %c0_15 = arith.constant 0 : index
      %16 = vector.load %arg6[%c0_14, %c0_15] : memref<200x128xf32, #tpu.memory_space<vmem>>, vector<200x128xf32>
      tpu.vector_store %arg6[%c0_14, %c0_15], %15 {strides = array<i32>} : memref<200x128xf32, #tpu.memory_space<vmem>>, vector<200x128xf32>,
    } else {
    }
    return
  }
  func.func @transform_0(%arg0: i32, %arg1: i32, %arg2: i32) -> (i32, i32) {
    %c0_i32 = arith.constant 0 : i32
    return %arg0, %arg2 : i32, i32
  }
  func.func @transform_1(%arg0: i32, %arg1: i32, %arg2: i32) -> (i32, i32) {
    %c0_i32 = arith.constant 0 : i32
    return %arg2, %arg1 : i32, i32
  }
  func.func @transform_2(%arg0: i32, %arg1: i32, %arg2: i32) -> (i32, i32) {
    %c0_i32 = arith.constant 0 : i32
    %c0_i32_0 = arith.constant 0 : i32
    return %c0_i32, %arg1 : i32, i32
  }
  func.func @transform_3(%arg0: i32, %arg1: i32, %arg2: i32) -> (i32, i32) {
    %c0_i32 = arith.constant 0 : i32
    return %arg0, %arg1 : i32, i32
  }
}

</mosaic_0001>

<bundles_post_ra>
// kernel: tpu_custom_call.1
= control target key start
LH: loop header
LB: loop body
LE: loop exit
PB: predicated region body
PF: predicated region fallthrough
CT: control target
= control target key end

     0   :  { %8 = vsyncpa [#allocation4], 0  ;;  %s903_s0 = inlined_call_operand.hbm [shape: f32[200,128], index: 0, kind: input, shape index: {}]   ;;  %s904_s1 = inlined_call_operand.hbm [shape: f32[128,128], index: 1, kind: input, shape index: {}]   ;;  %s905_s2 = inlined_call_operand.vmem [shape: f32[1,128], index: 2, kind: input, shape index: {}]   ;;  %s906_s3 = inlined_call_operand.hbm [shape: f32[200,128], index: 3, kind: output, shape index: {}]  }
   0x1   :  { %9 = vsyncpa [#allocation7], 0 }
   0x2   :  { %10 = vsyncpa [#allocation5], 0  ;;  %s750_s12 = smov [#allocation3]   ;;  %s678_s16 = scalar_lea.hbm %s903_s0, 3200 }
   0x3   :  { %s16_s13 = sshll.u32 %s750_s12, 4  ;;  %p679_p0 = scmp.ne.s32.totalorder %s903_s0, %s678_s16  ;;  %s17_s13 = int_to_ptr.vmem [resolvable:$true] %s16_s13 }
   0x4   :  { %p682_p1 = scmp.lt.u32.totalorder %s678_s16, %s903_s0 }
   0x6   :  { %p684_p2 = pnand %p682_p1, %p679_p0 }
   0x8   :  { %687 = shalt.err (!%p684_p2)
}
   0x9   :  { %s688_s21 = scalar_lea.vmem %s17_s13, 3200  ;;  %p693_p4 = scmp.lt.s32.totalorder %s17_s13, %s17_s13 }
   0xa   :  { %p689_p3 = scmp.ne.s32.totalorder %s17_s13, %s688_s21  ;;  %p694_p5 = scmp.lt.s32.totalorder %s688_s21, %s688_s21 }
   0xc   :  { %p695_p6 = por %p694_p5, %p693_p4 }
   0xe   :  { %p696_p7 = pnand %p695_p6, %p689_p3 }
  0x10   :  { %699 = shalt.err (!%p696_p7)
}
  0x11   :  { %s751_s22 = smov 128   ;;  %s752_s23 = smov 8  }
  0x12   :  { %22 = dma.hbm_to_vmem [thread:$0]  %s903_s0, 3200, %s17_s13, [#allocation4], %s751_s22, %s751_s22, %s752_s23  }
  0x13   :  { %s753_s26 = smov [#allocation6]   ;;  %s700_s30 = scalar_lea.hbm %s904_s1, 2048 }
  0x14   :  { %s28_s27 = sshll.u32 %s753_s26, 4  ;;  %p701_p8 = scmp.ne.s32.totalorder %s904_s1, %s700_s30  ;;  %s29_s27 = int_to_ptr.vmem [resolvable:$true] %s28_s27 }
  0x15   :  { %p704_p9 = scmp.lt.u32.totalorder %s700_s30, %s904_s1 }
  0x17   :  { %p706_p10 = pnand %p704_p9, %p701_p8 }
  0x19   :  { %709 = shalt.err (!%p706_p10)
}
  0x1a   :  { %s710_s8 = scalar_lea.vmem %s29_s27, 2048  ;;  %p715_p12 = scmp.lt.s32.totalorder %s29_s27, %s29_s27 }
  0x1b   :  { %p711_p11 = scmp.ne.s32.totalorder %s29_s27, %s710_s8  ;;  %p716_p13 = scmp.lt.s32.totalorder %s710_s8, %s710_s8 }
  0x1d   :  { %p717_p0 = por %p716_p13, %p715_p12 }
  0x1f   :  { %p718_p1 = pnand %p717_p0, %p711_p11 }
  0x21   :  { %721 = shalt.err (!%p718_p1)
}
  0x22   :  { %34 = dma.hbm_to_vmem [thread:$0]  %s904_s1, 2048, %s29_s27, [#allocation7], %s751_s22, %s751_s22, %s752_s23  }
  0x23   :  { %744 = dma.done.wait [#allocation4], 3200  }
  0x24   :  { %745 = vsyncadd [#allocation4], 4294964096 }
  0x25   :  { %746 = dma.done.wait [#allocation7], 2048  }
  0x26   :  { %747 = vsyncadd [#allocation7], 4294965248  ;;  %v754_v0 = vmov 0.0|0.0   ;;  %vm755_vm0 = vmmov 0   ;;  %v756_v1 = vmov 0.0   ;;  %v122_v2 = vld [vmem:[#allocation6] sm:$0xff] }
  0x27   :  { %630 = vmatprep.subr.bf16.mxu0 %v754_v0  ;;  %654 = vmatprep.subr.bf16.mxu1 %v754_v0  ;;  %v123_v3 = vld [vmem:[#allocation6 + $0x8] sm:$0xff]  ;;  %v124_v4 = vld [vmem:[#allocation6 + $0x10] sm:$0xff]  ;;  %v125_v6 = vld [vmem:[#allocation6 + $0x18] sm:$0xff] }
  0x28   :  { %555 = vmatprep.mubr.msk.f32.mxu0 %vm755_vm0, %v756_v1  ;;  %594 = vmatprep.mubr.msk.f32.mxu1 %vm755_vm0, %v756_v1  ;;  %v631_v5 = vpack.c.bf16 %v123_v3, %v122_v2  ;;  %v634_v7 = vpack.c.bf16 %v125_v6, %v124_v4  ;;  %v126_v8 = vld [vmem:[#allocation6 + $0x20] sm:$0xff]  ;;  %v127_v9 = vld [vmem:[#allocation6 + $0x28] sm:$0xff]  ;;  %v128_v11 = vld [vmem:[#allocation6 + $0x30] sm:$0xff] }
  0x29   :  { %v637_v10 = vpack.c.bf16 %v127_v9, %v126_v8  ;;  %v129_v12 = vld [vmem:[#allocation6 + $0x38] sm:$0xff]  ;;  %v130_v14 = vld [vmem:[#allocation6 + $0x40] sm:$0xff]  ;;  %v131_v15 = vld [vmem:[#allocation6 + $0x48] sm:$0xff] }
  0x2a   :  { %632 = vmatpush3.bf16.msra.mxu0 %v631_v5  ;;  %662 = vmatpush3.bf16.msra.mxu1 %v631_v5  ;;  %v640_v13 = vpack.c.bf16 %v129_v12, %v128_v11  ;;  %v643_v16 = vpack.c.bf16 %v131_v15, %v130_v14  ;;  %v132_v17 = vld [vmem:[#allocation6 + $0x50] sm:$0xff]  ;;  %v133_v18 = vld [vmem:[#allocation6 + $0x58] sm:$0xff]  ;;  %v134_v20 = vld [vmem:[#allocation6 + $0x60] sm:$0xff] }
  0x2b   :  { %633 = vmatprep.subr.bf16.mxu0 %v754_v0  ;;  %655 = vmatprep.subr.bf16.mxu1 %v754_v0  ;;  %v646_v19 = vpack.c.bf16 %v133_v18, %v132_v17  ;;  %v135_v21 = vld [vmem:[#allocation6 + $0x68] sm:$0xff]  ;;  %v136_v23 = vld [vmem:[#allocation6 + $0x70] sm:$0xff]  ;;  %v137_v24 = vld [vmem:[#allocation6 + $0x78] sm:$0xff] }
  0x2c   :  { %v649_v22 = vpack.c.bf16 %v135_v21, %v134_v20  ;;  %v652_v25 = vpack.c.bf16 %v137_v24, %v136_v23  ;;  %v97_v26 = vld [vmem:[#allocation3] sm:$0xff]  ;;  %v110_v27 = vld [vmem:[#allocation3 + $0x68] sm:$0xff]  ;;  %v111_v29 = vld [vmem:[#allocation3 + $0x70] sm:$0xff] }
  0x2d   :  { %v98_v28 = vld [vmem:[#allocation3 + $0x8] sm:$0xff]  ;;  %v99_v30 = vld [vmem:[#allocation3 + $0x10] sm:$0xff]  ;;  %v112_v31 = vld [vmem:[#allocation3 + $0x78] sm:$0xff] }
  0x2e   :  { %635 = vmatpush3.bf16.msra.mxu0 %v634_v7  ;;  %663 = vmatpush3.bf16.msra.mxu1 %v634_v7  ;;  %v100_v32 = vld [vmem:[#allocation3 + $0x18] sm:$0xff]  ;;  %v113_v33 = vld [vmem:[#allocation3 + $0x80] sm:$0xff]  ;;  %v114_v35 = vld [vmem:[#allocation3 + $0x88] sm:$0xff] }
  0x2f   :  { %636 = vmatprep.subr.bf16.mxu0 %v754_v0  ;;  %656 = vmatprep.subr.bf16.mxu1 %v754_v0  ;;  %v101_v34 = vld [vmem:[#allocation3 + $0x20] sm:$0xff]  ;;  %v102_v36 = vld [vmem:[#allocation3 + $0x28] sm:$0xff]  ;;  %v115_v37 = vld [vmem:[#allocation3 + $0x90] sm:$0xff] }
  0x30   :  { %v103_v38 = vld [vmem:[#allocation3 + $0x30] sm:$0xff]  ;;  %v116_v39 = vld [vmem:[#allocation3 + $0x98] sm:$0xff]  ;;  %v117_v41 = vld [vmem:[#allocation3 + $0xa0] sm:$0xff] }
  0x31   :  { %v104_v40 = vld [vmem:[#allocation3 + $0x38] sm:$0xff]  ;;  %v105_v42 = vld [vmem:[#allocation3 + $0x40] sm:$0xff]  ;;  %v118_v43 = vld [vmem:[#allocation3 + $0xa8] sm:$0xff] }
  0x32   :  { %638 = vmatpush3.bf16.msra.mxu0 %v637_v10  ;;  %664 = vmatpush3.bf16.msra.mxu1 %v637_v10  ;;  %v106_v44 = vld [vmem:[#allocation3 + $0x48] sm:$0xff]  ;;  %v119_v45 = vld [vmem:[#allocation3 + $0xb0] sm:$0xff]  ;;  %v120_v47 = vld [vmem:[#allocation3 + $0xb8] sm:$0xff] }
  0x33   :  { %639 = vmatprep.subr.bf16.mxu0 %v754_v0  ;;  %657 = vmatprep.subr.bf16.mxu1 %v754_v0  ;;  %v107_v46 = vld [vmem:[#allocation3 + $0x50] sm:$0xff]  ;;  %v108_v48 = vld [vmem:[#allocation3 + $0x58] sm:$0xff]  ;;  %v121_v49 = vld [vmem:[#allocation3 + $0xc0] sm:$0xff] }
  0x34   :  { %v109_v50 = vld [vmem:[#allocation3 + $0x60] sm:$0xff] }
  0x35   :  { %v861_v51 = vld [vmem:[%s905_s2] ss:$0 sm:$0xff]  ;;  %s757_s2 = smov [#allocation8]  }
  0x36   :  { %641 = vmatpush3.bf16.msra.mxu0 %v640_v13  ;;  %665 = vmatpush3.bf16.msra.mxu1 %v640_v13  ;;  %s468_s11 = sshll.u32 %s757_s2, 4  ;;  %s469_s11 = int_to_ptr.vmem [resolvable:$true] %s468_s11 }
  0x37   :  { %642 = vmatprep.subr.bf16.mxu0 %v754_v0  ;;  %658 = vmatprep.subr.bf16.mxu1 %v754_v0  ;;  %s722_s12 = scalar_lea.vmem %s469_s11, 3200  ;;  %p727_p3 = scmp.lt.s32.totalorder %s469_s11, %s469_s11 }
  0x38   :  { %p723_p2 = scmp.ne.s32.totalorder %s469_s11, %s722_s12  ;;  %p728_p4 = scmp.lt.s32.totalorder %s722_s12, %s722_s12 }
  0x3a   :  { %644 = vmatpush3.bf16.msra.mxu0 %v643_v16  ;;  %666 = vmatpush3.bf16.msra.mxu1 %v643_v16  ;;  %p729_p5 = por %p728_p4, %p727_p3 }
  0x3b   :  { %645 = vmatprep.subr.bf16.mxu0 %v754_v0  ;;  %659 = vmatprep.subr.bf16.mxu1 %v754_v0 }
  0x3c   :  { %p730_p6 = pnand %p729_p5, %p723_p2 }
  0x3e   :  { %647 = vmatpush3.bf16.msra.mxu0 %v646_v19  ;;  %667 = vmatpush3.bf16.msra.mxu1 %v646_v19 }
  0x3f   :  { %648 = vmatprep.subr.bf16.mxu0 %v754_v0  ;;  %660 = vmatprep.subr.bf16.mxu1 %v754_v0 }
  0x42   :  { %650 = vmatpush3.bf16.msra.mxu0 %v649_v22  ;;  %668 = vmatpush3.bf16.msra.mxu1 %v649_v22 }
  0x43   :  { %651 = vmatprep.subr.bf16.mxu0 %v754_v0  ;;  %661 = vmatprep.subr.bf16.mxu1 %v754_v0 }
  0x46   :  { %653 = vmatpush3.bf16.msra.mxu0 %v652_v25  ;;  %669 = vmatpush3.bf16.msra.mxu1 %v652_v25 }
  0x49   :  { %556 = vmatmul.mubr.f32.vlgmr.msra.gmra.mrb[0].mxu0 %v97_v26  ;;  %595 = vmatmul.mubr.f32.vlgmr.msra.gmra.mrb[0].mxu1 %v110_v27 }
  0x4a   :  { %558 = vmatprep.mubr.msk.f32.mxu0 %vm755_vm0, %v756_v1  ;;  %597 = vmatprep.mubr.msk.f32.mxu1 %vm755_vm0, %v756_v1 }
  0x4d   :  { %559 = vmatmul.mubr.f32.gmra.mrb[2].mxu0 %v98_v28  ;;  %598 = vmatmul.mubr.f32.gmra.mrb[2].mxu1 %v111_v29 }
  0x4e   :  { %561 = vmatprep.mubr.msk.f32.mxu0 %vm755_vm0, %v756_v1  ;;  %600 = vmatprep.mubr.msk.f32.mxu1 %vm755_vm0, %v756_v1 }
  0x51   :  { %562 = vmatmul.mubr.f32.gmra.mrb[4].mxu0 %v99_v30  ;;  %601 = vmatmul.mubr.f32.gmra.mrb[4].mxu1 %v112_v31 }
  0x52   :  { %564 = vmatprep.mubr.msk.f32.mxu0 %vm755_vm0, %v756_v1  ;;  %603 = vmatprep.mubr.msk.f32.mxu1 %vm755_vm0, %v756_v1 }
  0x55   :  { %565 = vmatmul.mubr.f32.gmra.mrb[6].mxu0 %v100_v32  ;;  %604 = vmatmul.mubr.f32.gmra.mrb[6].mxu1 %v113_v33 }
  0x56   :  { %567 = vmatprep.mubr.msk.f32.mxu0 %vm755_vm0, %v756_v1  ;;  %606 = vmatprep.mubr.msk.f32.mxu1 %vm755_vm0, %v756_v1 }
  0x59   :  { %568 = vmatmul.mubr.f32.gmra.mrb[8].mxu0 %v101_v34  ;;  %607 = vmatmul.mubr.f32.gmra.mrb[8].mxu1 %v114_v35 }
  0x5a   :  { %570 = vmatprep.mubr.msk.f32.mxu0 %vm755_vm0, %v756_v1  ;;  %609 = vmatprep.mubr.msk.f32.mxu1 %vm755_vm0, %v756_v1 }
  0x5d   :  { %571 = vmatmul.mubr.f32.gmra.mrb[10].mxu0 %v102_v36  ;;  %610 = vmatmul.mubr.f32.gmra.mrb[10].mxu1 %v115_v37 }
  0x5e   :  { %573 = vmatprep.mubr.msk.f32.mxu0 %vm755_vm0, %v756_v1  ;;  %612 = vmatprep.mubr.msk.f32.mxu1 %vm755_vm0, %v756_v1 }
  0x61   :  { %574 = vmatmul.mubr.f32.gmra.mrb[12].mxu0 %v103_v38  ;;  %613 = vmatmul.mubr.f32.gmra.mrb[12].mxu1 %v116_v39 }
  0x62   :  { %576 = vmatprep.mubr.msk.f32.mxu0 %vm755_vm0, %v756_v1  ;;  %615 = vmatprep.mubr.msk.f32.mxu1 %vm755_vm0, %v756_v1 }
  0x65   :  { %577 = vmatmul.mubr.f32.gmra.mrb[14].mxu0 %v104_v40  ;;  %616 = vmatmul.mubr.f32.gmra.mrb[14].mxu1 %v117_v41 }
  0x66   :  { %579 = vmatprep.mubr.msk.f32.mxu0 %vm755_vm0, %v756_v1  ;;  %618 = vmatprep.mubr.msk.f32.mxu1 %vm755_vm0, %v756_v1 }
  0x69   :  { %580 = vmatmul.mubr.f32.gmra.mrb[16].mxu0 %v105_v42  ;;  %619 = vmatmul.mubr.f32.gmra.mrb[16].mxu1 %v118_v43 }
  0x6a   :  { %582 = vmatprep.mubr.msk.f32.mxu0 %vm755_vm0, %v756_v1  ;;  %621 = vmatprep.mubr.msk.f32.mxu1 %vm755_vm0, %v756_v1 }
  0x6d   :  { %583 = vmatmul.mubr.f32.gmra.mrb[18].mxu0 %v106_v44  ;;  %622 = vmatmul.mubr.f32.gmra.mrb[18].mxu1 %v119_v45 }
  0x6e   :  { %585 = vmatprep.mubr.msk.f32.mxu0 %vm755_vm0, %v756_v1  ;;  %624 = vmatprep.mubr.msk.f32.mxu1 %vm755_vm0, %v756_v1 }
  0x71   :  { %586 = vmatmul.mubr.f32.gmra.mrb[20].mxu0 %v107_v46  ;;  %625 = vmatmul.mubr.f32.gmra.mrb[20].mxu1 %v120_v47 }
  0x72   :  { %588 = vmatprep.mubr.msk.f32.mxu0 %vm755_vm0, %v756_v1  ;;  %627 = vmatprep.mubr.msk.f32.mxu1 %vm755_vm0, %v756_v1 }
  0x75   :  { %589 = vmatmul.mubr.f32.gmra.mrb[22].mxu0 %v108_v48  ;;  %628 = vmatmul.mubr.f32.gmra.mrb[22].mxu1 %v121_v49 }
  0x76   :  { %591 = vmatprep.mubr.msk.f32.mxu0 %vm755_vm0, %v756_v1 }
  0x79   :  { %592 = vmatmul.mubr.f32.gmra.mrb[24].mxu0 %v109_v50 }
 0x11c   :  { %v204_v52 = vpop.f32.mrb[0].mxu0  ;;  %v269_v53 = vpop.f32.mrb[0].mxu1 }
 0x11d   :  { %v413_v54 = vadd.f32 %v861_v51, %v204_v52  ;;  %v557_v55 = vpop.f32.mrb[1].mxu0  ;;  %v426_v56 = vadd.f32 %v861_v51, %v269_v53  ;;  %v596_v57 = vpop.f32.mrb[1].mxu1 }
 0x11f   :  { %438 = vst [vmem:[#allocation8] sm:$0xff] %v413_v54  ;;  %451 = vst [vmem:[#allocation8 + $0x68] sm:$0xff] %v426_v56 }
 0x120   :  { %v209_v58 = vpop.f32.mrb[2].mxu0  ;;  %v274_v59 = vpop.f32.mrb[2].mxu1 }
 0x121   :  { %v414_v60 = vadd.f32 %v861_v51, %v209_v58  ;;  %v560_v61 = vpop.f32.mrb[3].mxu0  ;;  %v427_v62 = vadd.f32 %v861_v51, %v274_v59  ;;  %v599_v63 = vpop.f32.mrb[3].mxu1 }
 0x123   :  { %439 = vst [vmem:[#allocation8 + $0x8] sm:$0xff] %v414_v60  ;;  %452 = vst [vmem:[#allocation8 + $0x70] sm:$0xff] %v427_v62 }
 0x124   :  { %v214_v0 = vpop.f32.mrb[4].mxu0  ;;  %v279_v1 = vpop.f32.mrb[4].mxu1 }
 0x125   :  { %v415_v2 = vadd.f32 %v861_v51, %v214_v0  ;;  %v563_v3 = vpop.f32.mrb[5].mxu0  ;;  %v428_v4 = vadd.f32 %v861_v51, %v279_v1  ;;  %v602_v5 = vpop.f32.mrb[5].mxu1 }
 0x127   :  { %440 = vst [vmem:[#allocation8 + $0x10] sm:$0xff] %v415_v2  ;;  %453 = vst [vmem:[#allocation8 + $0x78] sm:$0xff] %v428_v4 }
 0x128   :  { %v219_v6 = vpop.f32.mrb[6].mxu0  ;;  %v284_v7 = vpop.f32.mrb[6].mxu1 }
 0x129   :  { %v416_v8 = vadd.f32 %v861_v51, %v219_v6  ;;  %v566_v9 = vpop.f32.mrb[7].mxu0  ;;  %v429_v10 = vadd.f32 %v861_v51, %v284_v7  ;;  %v605_v11 = vpop.f32.mrb[7].mxu1 }
 0x12b   :  { %441 = vst [vmem:[#allocation8 + $0x18] sm:$0xff] %v416_v8  ;;  %454 = vst [vmem:[#allocation8 + $0x80] sm:$0xff] %v429_v10 }
 0x12c   :  { %v224_v12 = vpop.f32.mrb[8].mxu0  ;;  %v289_v13 = vpop.f32.mrb[8].mxu1 }
 0x12d   :  { %v417_v14 = vadd.f32 %v861_v51, %v224_v12  ;;  %v569_v15 = vpop.f32.mrb[9].mxu0  ;;  %v430_v16 = vadd.f32 %v861_v51, %v289_v13  ;;  %v608_v17 = vpop.f32.mrb[9].mxu1 }
 0x12f   :  { %442 = vst [vmem:[#allocation8 + $0x20] sm:$0xff] %v417_v14  ;;  %455 = vst [vmem:[#allocation8 + $0x88] sm:$0xff] %v430_v16 }
 0x130   :  { %v229_v18 = vpop.f32.mrb[10].mxu0  ;;  %v294_v19 = vpop.f32.mrb[10].mxu1 }
 0x131   :  { %v418_v20 = vadd.f32 %v861_v51, %v229_v18  ;;  %v572_v21 = vpop.f32.mrb[11].mxu0  ;;  %v431_v22 = vadd.f32 %v861_v51, %v294_v19  ;;  %v611_v23 = vpop.f32.mrb[11].mxu1 }
 0x133   :  { %443 = vst [vmem:[#allocation8 + $0x28] sm:$0xff] %v418_v20  ;;  %456 = vst [vmem:[#allocation8 + $0x90] sm:$0xff] %v431_v22 }
 0x134   :  { %v234_v24 = vpop.f32.mrb[12].mxu0  ;;  %v299_v25 = vpop.f32.mrb[12].mxu1 }
 0x135   :  { %v419_v26 = vadd.f32 %v861_v51, %v234_v24  ;;  %v575_v27 = vpop.f32.mrb[13].mxu0  ;;  %v432_v28 = vadd.f32 %v861_v51, %v299_v25  ;;  %v614_v29 = vpop.f32.mrb[13].mxu1 }
 0x137   :  { %444 = vst [vmem:[#allocation8 + $0x30] sm:$0xff] %v419_v26  ;;  %457 = vst [vmem:[#allocation8 + $0x98] sm:$0xff] %v432_v28 }
 0x138   :  { %v239_v30 = vpop.f32.mrb[14].mxu0  ;;  %v304_v31 = vpop.f32.mrb[14].mxu1 }
 0x139   :  { %v420_v32 = vadd.f32 %v861_v51, %v239_v30  ;;  %v578_v33 = vpop.f32.mrb[15].mxu0  ;;  %v433_v34 = vadd.f32 %v861_v51, %v304_v31  ;;  %v617_v35 = vpop.f32.mrb[15].mxu1 }
 0x13b   :  { %445 = vst [vmem:[#allocation8 + $0x38] sm:$0xff] %v420_v32  ;;  %458 = vst [vmem:[#allocation8 + $0xa0] sm:$0xff] %v433_v34 }
 0x13c   :  { %v244_v36 = vpop.f32.mrb[16].mxu0  ;;  %v309_v37 = vpop.f32.mrb[16].mxu1 }
 0x13d   :  { %v421_v38 = vadd.f32 %v861_v51, %v244_v36  ;;  %v581_v39 = vpop.f32.mrb[17].mxu0  ;;  %v434_v40 = vadd.f32 %v861_v51, %v309_v37  ;;  %v620_v41 = vpop.f32.mrb[17].mxu1 }
 0x13f   :  { %446 = vst [vmem:[#allocation8 + $0x40] sm:$0xff] %v421_v38  ;;  %459 = vst [vmem:[#allocation8 + $0xa8] sm:$0xff] %v434_v40 }
 0x140   :  { %v249_v42 = vpop.f32.mrb[18].mxu0  ;;  %v314_v43 = vpop.f32.mrb[18].mxu1 }
 0x141   :  { %v422_v44 = vadd.f32 %v861_v51, %v249_v42  ;;  %v584_v45 = vpop.f32.mrb[19].mxu0  ;;  %v435_v46 = vadd.f32 %v861_v51, %v314_v43  ;;  %v623_v47 = vpop.f32.mrb[19].mxu1 }
 0x143   :  { %447 = vst [vmem:[#allocation8 + $0x48] sm:$0xff] %v422_v44  ;;  %460 = vst [vmem:[#allocation8 + $0xb0] sm:$0xff] %v435_v46 }
 0x144   :  { %v254_v48 = vpop.f32.mrb[20].mxu0  ;;  %v319_v49 = vpop.f32.mrb[20].mxu1 }
 0x145   :  { %v423_v50 = vadd.f32 %v861_v51, %v254_v48  ;;  %v587_v52 = vpop.f32.mrb[21].mxu0  ;;  %v436_v53 = vadd.f32 %v861_v51, %v319_v49  ;;  %v626_v54 = vpop.f32.mrb[21].mxu1 }
 0x147   :  { %448 = vst [vmem:[#allocation8 + $0x50] sm:$0xff] %v423_v50  ;;  %461 = vst [vmem:[#allocation8 + $0xb8] sm:$0xff] %v436_v53 }
 0x148   :  { %v259_v55 = vpop.f32.mrb[22].mxu0  ;;  %v324_v56 = vpop.f32.mrb[22].mxu1 }
 0x149   :  { %v424_v57 = vadd.f32 %v861_v51, %v259_v55  ;;  %v590_v58 = vpop.f32.mrb[23].mxu0  ;;  %v437_v59 = vadd.f32 %v861_v51, %v324_v56  ;;  %v629_v60 = vpop.f32.mrb[23].mxu1 }
 0x14b   :  { %449 = vst [vmem:[#allocation8 + $0x58] sm:$0xff] %v424_v57  ;;  %462 = vst [vmem:[#allocation8 + $0xc0] sm:$0xff] %v437_v59 }
 0x14c   :  { %v264_v61 = vpop.f32.mrb[24].mxu0 }
 0x14d   :  { %v425_v62 = vadd.f32 %v861_v51, %v264_v61  ;;  %v593_v63 = vpop.f32.mrb[25].mxu0 }
 0x14f   :  { %450 = vst [vmem:[#allocation8 + $0x60] sm:$0xff] %v425_v62 }
 0x150   :  { %733 = shalt.err (!%p730_p6)
}
 0x151   :  { %s734_s15 = scalar_lea.hbm %s906_s3, 3200 }
 0x152   :  { %p735_p7 = scmp.ne.s32.totalorder %s906_s3, %s734_s15  ;;  %p738_p8 = scmp.lt.u32.totalorder %s734_s15, %s906_s3 }
 0x154   :  { %p740_p9 = pnand %p738_p8, %p735_p7 }
 0x156   :  { %743 = shalt.err (!%p740_p9)
}
 0x157   :  { %474 = dma.vmem_to_hbm [thread:$0]  %s469_s11, 3200, %s906_s3, [#allocation5], %s751_s22, %s751_s22, %s752_s23  }
 0x158   :  { %748 = dma.done.wait [#allocation5], 3200  }
 0x159   :  { %749 = vsyncadd [#allocation5], 4294964096 }
 0x15a   :  { %478 = vsyncpa [#allocation4], 1 }
 0x15b   :  { %479 = vsyncpa [#allocation7], 1 }
 0x15c   :  { %480 = vsyncpa [#allocation5], 1 }

</bundles_post_ra>
